<compile_context>
chip_gen: v7x
topology: tpu7x:2x2x1
jax: 0.10.0
libtpu: 0.0.40
codegen_flags: <defaults>
</compile_context>

<pallas_src>
import functools

import numpy as np
import jax
import jax.numpy as jnp
from jax.experimental import pallas as pl
from jax.experimental.pallas import tpu as pltpu


def _round_up(x, m):
    return ((x + m - 1) // m) * m


def _rmse_comb_kernel(p_ref, t_ref, out_ref, *, beta, ny, n_rows, n_cols):
    # p_ref / t_ref : (TILE_R, TILE_C) f32 blocks of the (B, T*ny) views.
    # out_ref       : (4, 128) f32 per-tile partials
    #                 rows = [sum_raw, cnt_raw, sum_log, cnt_log], lane k = channel k
    tile_r, tile_c = p_ref.shape
    chunk = 8
    n_chunks = tile_r // chunk

    row0 = pl.program_id(0) * tile_r
    col0 = pl.program_id(1) * tile_c

    # Column-dependent quantities (shared by all row-chunks of this tile).
    col_idx = col0 + jax.lax.broadcasted_iota(jnp.int32, (1, tile_c), 1)
    col_valid = col_idx < n_cols           # masks the ragged column tail
    col_ch = col_idx % ny                  # channel id of each column

    beta_f = jnp.float32(beta)
    pt1 = jnp.float32(0.1)

    def body(i, carry):
        s0, n0, s1, n1 = carry
        r = pl.multiple_of(i * chunk, chunk)
        p = p_ref[pl.ds(r, chunk), :]
        t = t_ref[pl.ds(r, chunk), :]

        row_idx = row0 + r + jax.lax.broadcasted_iota(jnp.int32, (chunk, 1), 0)
        valid = (row_idx < n_rows) & col_valid          # masks row/col tails

        # raw-space masked squared error (mask = target is not NaN)
        m0 = valid & (t == t)
        d0 = jnp.where(m0, p - t, 0.0)

        # log-space masked squared error (mask from the transformed target)
        p1 = jnp.log10(jnp.sqrt(p + beta_f) + pt1)
        t1 = jnp.log10(jnp.sqrt(t + beta_f) + pt1)
        m1 = valid & (t1 == t1)
        d1 = jnp.where(m1, p1 - t1, 0.0)

        s0 = s0 + jnp.sum(d0 * d0, axis=0, keepdims=True)
        n0 = n0 + jnp.sum(m0.astype(jnp.float32), axis=0, keepdims=True)
        s1 = s1 + jnp.sum(d1 * d1, axis=0, keepdims=True)
        n1 = n1 + jnp.sum(m1.astype(jnp.float32), axis=0, keepdims=True)
        return s0, n0, s1, n1

    zero = jnp.zeros((1, tile_c), jnp.float32)
    accs = jax.lax.fori_loop(0, n_chunks, body, (zero, zero, zero, zero),
                             unroll=(n_chunks <= 8))

    # Pack per-channel partials into a lane-dense (4, 128) output block.
    row_id = jax.lax.broadcasted_iota(jnp.int32, (4, 128), 0)
    lane_id = jax.lax.broadcasted_iota(jnp.int32, (4, 128), 1)
    out = jnp.zeros((4, 128), jnp.float32)
    for k in range(ny):                      # ny is tiny and static
        chm = col_ch == k                    # (1, tile_c)
        for qi in range(4):
            v = jnp.sum(jnp.where(chm, accs[qi], 0.0))          # scalar
            out = out + jnp.where((row_id == qi) & (lane_id == k), v, 0.0)
    out_ref[...] = out


def rmse_loss_comb(output, target, alpha, beta=1e-6, block_bytes=2 << 20):
    """output, target: (B, T, ny) — same axis convention as the PyTorch module."""
    output = jnp.asarray(output, jnp.float32)
    target = jnp.asarray(target, jnp.float32)
    assert output.shape == target.shape and output.ndim == 3
    B, T, ny = output.shape
    assert B * T > 0 and 1 <= ny <= 128

    TN = T * ny
    # Free, contiguous view (no transpose, no copy): channel of column j is j % ny.
    p2 = output.reshape(B, TN)
    t2 = target.reshape(B, TN)

    # Column tile: lane-dense multiple of 128 (capped); row tile: multiple of 8,
    # sized so one input block is ~block_bytes (DMA amortisation).
    tile_c = min(_round_up(TN, 128), 4096)
    max_r = _round_up(B, 8)
    tile_r = max(8, min(max_r, (block_bytes // (tile_c * 4)) // 8 * 8))

    gr = pl.cdiv(B, tile_r)
    gc = pl.cdiv(TN, tile_c)

    # v7x megacore: make sure there are >= 2 grid tiles whenever the data allows,
    # so the "parallel" axes actually shard across both TensorCores.
    if gr * gc < 2:
        if B > 8:
            tile_r = _round_up(pl.cdiv(B, 2), 8)
            gr = pl.cdiv(B, tile_r)
        elif TN > 128:
            tile_c = _round_up(pl.cdiv(TN, 2), 128)
            gc = pl.cdiv(TN, tile_c)

    kernel = functools.partial(_rmse_comb_kernel, beta=float(beta), ny=ny,
                               n_rows=B, n_cols=TN)

    partials = pl.pallas_call(
        kernel,
        out_shape=jax.ShapeDtypeStruct((gr, gc, 4, 128), jnp.float32),
        grid=(gr, gc),
        in_specs=[
            pl.BlockSpec((tile_r, tile_c), lambda i, j: (i, j)),
            pl.BlockSpec((tile_r, tile_c), lambda i, j: (i, j)),
        ],
        out_specs=pl.BlockSpec((None, None, 4, 128), lambda i, j: (i, j, 0, 0)),
        compiler_params=pltpu.CompilerParams(
            dimension_semantics=("parallel", "parallel"),
            vmem_limit_bytes=32 << 20,
        ),
    )(p2, t2)

    # O(ny) epilogue: cross-tile totals, per-channel RMSEs, alpha combination.
    totals = jnp.sum(partials, axis=(0, 1))          # (4, 128)
    s0, c0 = totals[0, :ny], totals[1, :ny]
    s1, c1 = totals[2, :ny], totals[3, :ny]
    loss1 = jnp.sqrt(s0 / c0)
    loss2 = jnp.sqrt(s1 / c1)
    return jnp.sum((1.0 - alpha) * loss1 + alpha * loss2)


def _ref_loss_numpy(output, target, alpha, beta):
    """Pure numpy replica of the PyTorch forward (for validation)."""
    output = np.asarray(output, np.float64)
    target = np.asarray(target, np.float64)
    ny = target.shape[2]
    loss = 0.0
    for k in range(ny):
        p0 = output[:, :, k]
        t0 = target[:, :, k]
        with np.errstate(invalid="ignore"):
            p1 = np.log10(np.sqrt(p0 + beta) + 0.1)
            t1 = np.log10(np.sqrt(t0 + beta) + 0.1)
        mask = ~np.isnan(t0)
        loss1 = np.sqrt(np.mean((p0[mask] - t0[mask]) ** 2))
        mask1 = ~np.isnan(t1)
        loss2 = np.sqrt(np.mean((p1[mask1] - t1[mask1]) ** 2))
        loss += (1.0 - alpha) * loss1 + alpha * loss2
    return loss


def _run_case(key, B, T, ny, alpha, beta, nan_frac):
    k1, k2, k3 = jax.random.split(key, 3)
    output = jnp.abs(jax.random.normal(k1, (B, T, ny), dtype=jnp.float32))
    target = jnp.abs(jax.random.normal(k2, (B, T, ny), dtype=jnp.float32))
    nan_mask = jax.random.bernoulli(k3, nan_frac, (B, T, ny))
    target = jnp.where(nan_mask, jnp.float32(np.nan), target)

    ref = _ref_loss_numpy(np.asarray(output), np.asarray(target), alpha, beta)
    loss = jax.block_until_ready(rmse_loss_comb(output, target, alpha=alpha, beta=beta))
    assert np.isfinite(float(loss))
    np.testing.assert_allclose(float(loss), float(ref), rtol=2e-3, atol=1e-5)


if __name__ == "__main__":
    key = jax.random.PRNGKey(0)
    ka, kb = jax.random.split(key)

    # Case 1: exercises the 2-tile (row-split) path + column-tail masking.
    _run_case(ka, B=16, T=100, ny=3, alpha=0.25, beta=1e-6, nan_frac=0.05)
    # Case 2: awkward shapes — row tail (B=5 < 8) and column tail on 2 tiles.
    _run_case(kb, B=5, T=37, ny=4, alpha=0.6, beta=1e-6, nan_frac=0.1)

    print("KERNEL_OK")
</pallas_src>

<mosaic_0001>
module attributes {stable_mosaic.version = 11 : i64} {
  func.func @_rmse_comb_kernel(%arg0: i32, %arg1: i32, %arg2: memref<8x384xf32, #tpu.memory_space<vmem>>, %arg3: memref<8x384xf32, #tpu.memory_space<vmem>>, %arg4: memref<1x1x4x128xf32, #tpu.memory_space<vmem>>) attributes {dimension_semantics = [#tpu.dimension_semantics<parallel>, #tpu.dimension_semantics<parallel>], iteration_bounds = array<i64: 2, 1>, scalar_prefetch = 0 : i64, scratch_operands = 0 : i64, tpu.core_type = #tpu.core_type<tc>, window_params = [{transform_indices = @transform_0, window_bounds = array<i64: 8, 384>}, {transform_indices = @transform_1, window_bounds = array<i64: 8, 384>}, {transform_indices = @transform_2, window_bounds = array<i64: 1, 1, 4, 128>}]} {
    %c8_i32 = arith.constant 8 : i32
    %0 = arith.muli %arg0, %c8_i32 : i32
    %c384_i32 = arith.constant 384 : i32
    %1 = arith.muli %arg1, %c384_i32 : i32
    %2 = tpu.iota {dimensions = array<i32: 1>} : vector<1x384xi32>
    %3 = vector.broadcast %1 : i32 to vector<1x384xi32>
    %4 = arith.addi %3, %2 : vector<1x384xi32>
    %c300_i32 = arith.constant 300 : i32
    %5 = vector.broadcast %c300_i32 : i32 to vector<1x384xi32>
    %6 = arith.cmpi slt, %4, %5 : vector<1x384xi32>
    %c3_i32 = arith.constant 3 : i32
    %c0_i32 = arith.constant 0 : i32
    %7 = arith.cmpi eq, %c3_i32, %c0_i32 : i32
    %c1_i32 = arith.constant 1 : i32
    %8 = arith.select %7, %c1_i32, %c3_i32 : i32
    %9 = vector.broadcast %8 : i32 to vector<1x384xi32>
    %10 = arith.remsi %4, %9 : vector<1x384xi32>
    %c0_i32_0 = arith.constant 0 : i32
    %11 = vector.broadcast %c0_i32_0 : i32 to vector<1x384xi32>
    %12 = arith.cmpi ne, %10, %11 : vector<1x384xi32>
    %c0_i32_1 = arith.constant 0 : i32
    %13 = vector.broadcast %c0_i32_1 : i32 to vector<1x384xi32>
    %14 = arith.cmpi slt, %10, %13 : vector<1x384xi32>
    %c0_i32_2 = arith.constant 0 : i32
    %15 = arith.cmpi slt, %8, %c0_i32_2 : i32
    %16 = vector.broadcast %15 : i1 to vector<1x384xi1>
    %17 = vector.broadcast %16 : vector<1x384xi1> to vector<1x384xi1>
    %18 = arith.xori %14, %17 : vector<1x384xi1>
    %19 = arith.andi %18, %12 : vector<1x384xi1>
    %20 = vector.broadcast %8 : i32 to vector<1x384xi32>
    %21 = arith.addi %10, %20 : vector<1x384xi32>
    %22 = arith.select %19, %21, %10 : vector<1x384xi1>, vector<1x384xi32>
    %cst = arith.constant 0.000000e+00 : f32
    %23 = vector.broadcast %cst : f32 to vector<1x384xf32>
    %cst_3 = arith.constant 9.99999997E-7 : f32
    %cst_4 = arith.constant 1.000000e-01 : f32
    %c0_i32_5 = arith.constant 0 : i32
    %c8_i32_6 = arith.constant 8 : i32
    %24 = arith.muli %c0_i32_5, %c8_i32_6 : i32
    %25 = tpu.assume_multiple %24, 8 : i32
    %26 = arith.index_cast %25 : i32 to index
    %c0 = arith.constant 0 : index
    %27 = vector.load %arg2[%26, %c0] : memref<8x384xf32, #tpu.memory_space<vmem>>, vector<8x384xf32>
    %28 = arith.index_cast %25 : i32 to index
    %c0_7 = arith.constant 0 : index
    %29 = vector.load %arg3[%28, %c0_7] : memref<8x384xf32, #tpu.memory_space<vmem>>, vector<8x384xf32>
    %30 = arith.addi %0, %25 : i32
    %31 = tpu.iota {dimensions = array<i32: 0>} : vector<8x1xi32>
    %32 = vector.broadcast %30 : i32 to vector<8x1xi32>
    %33 = arith.addi %32, %31 : vector<8x1xi32>
    %c16_i32 = arith.constant 16 : i32
    %34 = vector.broadcast %c16_i32 : i32 to vector<8x1xi32>
    %35 = arith.cmpi slt, %33, %34 : vector<8x1xi32>
    %36 = vector.broadcast %35 : vector<8x1xi1> to vector<8x384xi1>
    %37 = vector.broadcast %6 : vector<1x384xi1> to vector<8x384xi1>
    %38 = arith.andi %36, %37 : vector<8x384xi1>
    %39 = arith.cmpf oeq, %29, %29 : vector<8x384xf32>
    %40 = arith.andi %38, %39 : vector<8x384xi1>
    %41 = arith.subf %27, %29 : vector<8x384xf32>
    %cst_8 = arith.constant 0.000000e+00 : f32
    %42 = vector.broadcast %cst_8 : f32 to vector<8x384xf32>
    %43 = arith.select %40, %41, %42 : vector<8x384xi1>, vector<8x384xf32>
    %44 = vector.broadcast %cst_3 : f32 to vector<8x384xf32>
    %45 = arith.addf %27, %44 : vector<8x384xf32>
    %46 = math.sqrt %45 : vector<8x384xf32>
    %47 = vector.broadcast %cst_4 : f32 to vector<8x384xf32>
    %48 = arith.addf %46, %47 : vector<8x384xf32>
    %49 = math.log %48 : vector<8x384xf32>
    %cst_9 = arith.constant 0.434294492 : f32
    %50 = vector.broadcast %cst_9 : f32 to vector<8x384xf32>
    %51 = arith.mulf %49, %50 : vector<8x384xf32>
    %52 = vector.broadcast %cst_3 : f32 to vector<8x384xf32>
    %53 = arith.addf %29, %52 : vector<8x384xf32>
    %54 = math.sqrt %53 : vector<8x384xf32>
    %55 = vector.broadcast %cst_4 : f32 to vector<8x384xf32>
    %56 = arith.addf %54, %55 : vector<8x384xf32>
    %57 = math.log %56 : vector<8x384xf32>
    %cst_10 = arith.constant 0.434294492 : f32
    %58 = vector.broadcast %cst_10 : f32 to vector<8x384xf32>
    %59 = arith.mulf %57, %58 : vector<8x384xf32>
    %60 = arith.cmpf oeq, %59, %59 : vector<8x384xf32>
    %61 = arith.andi %38, %60 : vector<8x384xi1>
    %62 = arith.subf %51, %59 : vector<8x384xf32>
    %cst_11 = arith.constant 0.000000e+00 : f32
    %63 = vector.broadcast %cst_11 : f32 to vector<8x384xf32>
    %64 = arith.select %61, %62, %63 : vector<8x384xi1>, vector<8x384xf32>
    %65 = arith.mulf %43, %43 : vector<8x384xf32>
    %cst_12 = arith.constant dense<0.000000e+00> : vector<384xf32>
    %66 = vector.multi_reduction <add>, %65, %cst_12 [0] : vector<8x384xf32> to vector<384xf32>
    %67 = vector.shape_cast %66 : vector<384xf32> to vector<1x384xf32>
    %68 = arith.addf %23, %67 : vector<1x384xf32>
    %69 = arith.extui %40 : vector<8x384xi1> to vector<8x384xi32>
    %70 = arith.sitofp %69 : vector<8x384xi32> to vector<8x384xf32>
    %cst_13 = arith.constant dense<0.000000e+00> : vector<384xf32>
    %71 = vector.multi_reduction <add>, %70, %cst_13 [0] : vector<8x384xf32> to vector<384xf32>
    %72 = vector.shape_cast %71 : vector<384xf32> to vector<1x384xf32>
    %73 = arith.addf %23, %72 : vector<1x384xf32>
    %74 = arith.mulf %64, %64 : vector<8x384xf32>
    %cst_14 = arith.constant dense<0.000000e+00> : vector<384xf32>
    %75 = vector.multi_reduction <add>, %74, %cst_14 [0] : vector<8x384xf32> to vector<384xf32>
    %76 = vector.shape_cast %75 : vector<384xf32> to vector<1x384xf32>
    %77 = arith.addf %23, %76 : vector<1x384xf32>
    %78 = arith.extui %61 : vector<8x384xi1> to vector<8x384xi32>
    %79 = arith.sitofp %78 : vector<8x384xi32> to vector<8x384xf32>
    %cst_15 = arith.constant dense<0.000000e+00> : vector<384xf32>
    %80 = vector.multi_reduction <add>, %79, %cst_15 [0] : vector<8x384xf32> to vector<384xf32>
    %81 = vector.shape_cast %80 : vector<384xf32> to vector<1x384xf32>
    %82 = arith.addf %23, %81 : vector<1x384xf32>
    %c1_i32_16 = arith.constant 1 : i32
    %83 = tpu.iota {dimensions = array<i32: 0>} : vector<4x128xi32>
    %84 = tpu.iota {dimensions = array<i32: 1>} : vector<4x128xi32>
    %cst_17 = arith.constant 0.000000e+00 : f32
    %85 = vector.broadcast %cst_17 : f32 to vector<4x128xf32>
    %c0_i32_18 = arith.constant 0 : i32
    %86 = vector.broadcast %c0_i32_18 : i32 to vector<1x384xi32>
    %87 = arith.cmpi eq, %22, %86 : vector<1x384xi32>
    %cst_19 = arith.constant 0.000000e+00 : f32
    %88 = vector.broadcast %cst_19 : f32 to vector<1x384xf32>
    %89 = arith.select %87, %68, %88 : vector<1x384xi1>, vector<1x384xf32>
    %90 = vector.shape_cast %89 : vector<1x384xf32> to vector<1x1x384xf32>
    %cst_20 = arith.constant dense<0.000000e+00> : vector<1xf32>
    %91 = vector.multi_reduction <add>, %90, %cst_20 [1, 2] : vector<1x1x384xf32> to vector<1xf32>
    %92 = vector.shape_cast %91 : vector<1xf32> to vector<1x1x1xf32>
    %93 = vector.extract %92[0, 0, 0] : f32 from vector<1x1x1xf32>
    %c0_i32_21 = arith.constant 0 : i32
    %94 = vector.broadcast %c0_i32_21 : i32 to vector<4x128xi32>
    %95 = arith.cmpi eq, %83, %94 : vector<4x128xi32>
    %c0_i32_22 = arith.constant 0 : i32
    %96 = vector.broadcast %c0_i32_22 : i32 to vector<4x128xi32>
    %97 = arith.cmpi eq, %84, %96 : vector<4x128xi32>
    %98 = arith.andi %95, %97 : vector<4x128xi1>
    %cst_23 = arith.constant 0.000000e+00 : f32
    %99 = vector.broadcast %93 : f32 to vector<4x128xf32>
    %100 = vector.broadcast %cst_23 : f32 to vector<4x128xf32>
    %101 = arith.select %98, %99, %100 : vector<4x128xi1>, vector<4x128xf32>
    %102 = arith.addf %85, %101 : vector<4x128xf32>
    %cst_24 = arith.constant 0.000000e+00 : f32
    %103 = vector.broadcast %cst_24 : f32 to vector<1x384xf32>
    %104 = arith.select %87, %73, %103 : vector<1x384xi1>, vector<1x384xf32>
    %105 = vector.shape_cast %104 : vector<1x384xf32> to vector<1x1x384xf32>
    %cst_25 = arith.constant dense<0.000000e+00> : vector<1xf32>
    %106 = vector.multi_reduction <add>, %105, %cst_25 [1, 2] : vector<1x1x384xf32> to vector<1xf32>
    %107 = vector.shape_cast %106 : vector<1xf32> to vector<1x1x1xf32>
    %108 = vector.extract %107[0, 0, 0] : f32 from vector<1x1x1xf32>
    %c1_i32_26 = arith.constant 1 : i32
    %109 = vector.broadcast %c1_i32_26 : i32 to vector<4x128xi32>
    %110 = arith.cmpi eq, %83, %109 : vector<4x128xi32>
    %c0_i32_27 = arith.constant 0 : i32
    %111 = vector.broadcast %c0_i32_27 : i32 to vector<4x128xi32>
    %112 = arith.cmpi eq, %84, %111 : vector<4x128xi32>
    %113 = arith.andi %110, %112 : vector<4x128xi1>
    %cst_28 = arith.constant 0.000000e+00 : f32
    %114 = vector.broadcast %108 : f32 to vector<4x128xf32>
    %115 = vector.broadcast %cst_28 : f32 to vector<4x128xf32>
    %116 = arith.select %113, %114, %115 : vector<4x128xi1>, vector<4x128xf32>
    %117 = arith.addf %102, %116 : vector<4x128xf32>
    %cst_29 = arith.constant 0.000000e+00 : f32
    %118 = vector.broadcast %cst_29 : f32 to vector<1x384xf32>
    %119 = arith.select %87, %77, %118 : vector<1x384xi1>, vector<1x384xf32>
    %120 = vector.shape_cast %119 : vector<1x384xf32> to vector<1x1x384xf32>
    %cst_30 = arith.constant dense<0.000000e+00> : vector<1xf32>
    %121 = vector.multi_reduction <add>, %120, %cst_30 [1, 2] : vector<1x1x384xf32> to vector<1xf32>
    %122 = vector.shape_cast %121 : vector<1xf32> to vector<1x1x1xf32>
    %123 = vector.extract %122[0, 0, 0] : f32 from vector<1x1x1xf32>
    %c2_i32 = arith.constant 2 : i32
    %124 = vector.broadcast %c2_i32 : i32 to vector<4x128xi32>
    %125 = arith.cmpi eq, %83, %124 : vector<4x128xi32>
    %c0_i32_31 = arith.constant 0 : i32
    %126 = vector.broadcast %c0_i32_31 : i32 to vector<4x128xi32>
    %127 = arith.cmpi eq, %84, %126 : vector<4x128xi32>
    %128 = arith.andi %125, %127 : vector<4x128xi1>
    %cst_32 = arith.constant 0.000000e+00 : f32
    %129 = vector.broadcast %123 : f32 to vector<4x128xf32>
    %130 = vector.broadcast %cst_32 : f32 to vector<4x128xf32>
    %131 = arith.select %128, %129, %130 : vector<4x128xi1>, vector<4x128xf32>
    %132 = arith.addf %117, %131 : vector<4x128xf32>
    %cst_33 = arith.constant 0.000000e+00 : f32
    %133 = vector.broadcast %cst_33 : f32 to vector<1x384xf32>
    %134 = arith.select %87, %82, %133 : vector<1x384xi1>, vector<1x384xf32>
    %135 = vector.shape_cast %134 : vector<1x384xf32> to vector<1x1x384xf32>
    %cst_34 = arith.constant dense<0.000000e+00> : vector<1xf32>
    %136 = vector.multi_reduction <add>, %135, %cst_34 [1, 2] : vector<1x1x384xf32> to vector<1xf32>
    %137 = vector.shape_cast %136 : vector<1xf32> to vector<1x1x1xf32>
    %138 = vector.extract %137[0, 0, 0] : f32 from vector<1x1x1xf32>
    %c3_i32_35 = arith.constant 3 : i32
    %139 = vector.broadcast %c3_i32_35 : i32 to vector<4x128xi32>
    %140 = arith.cmpi eq, %83, %139 : vector<4x128xi32>
    %c0_i32_36 = arith.constant 0 : i32
    %141 = vector.broadcast %c0_i32_36 : i32 to vector<4x128xi32>
    %142 = arith.cmpi eq, %84, %141 : vector<4x128xi32>
    %143 = arith.andi %140, %142 : vector<4x128xi1>
    %cst_37 = arith.constant 0.000000e+00 : f32
    %144 = vector.broadcast %138 : f32 to vector<4x128xf32>
    %145 = vector.broadcast %cst_37 : f32 to vector<4x128xf32>
    %146 = arith.select %143, %144, %145 : vector<4x128xi1>, vector<4x128xf32>
    %147 = arith.addf %132, %146 : vector<4x128xf32>
    %c1_i32_38 = arith.constant 1 : i32
    %148 = vector.broadcast %c1_i32_38 : i32 to vector<1x384xi32>
    %149 = arith.cmpi eq, %22, %148 : vector<1x384xi32>
    %cst_39 = arith.constant 0.000000e+00 : f32
    %150 = vector.broadcast %cst_39 : f32 to vector<1x384xf32>
    %151 = arith.select %149, %68, %150 : vector<1x384xi1>, vector<1x384xf32>
    %152 = vector.shape_cast %151 : vector<1x384xf32> to vector<1x1x384xf32>
    %cst_40 = arith.constant dense<0.000000e+00> : vector<1xf32>
    %153 = vector.multi_reduction <add>, %152, %cst_40 [1, 2] : vector<1x1x384xf32> to vector<1xf32>
    %154 = vector.shape_cast %153 : vector<1xf32> to vector<1x1x1xf32>
    %155 = vector.extract %154[0, 0, 0] : f32 from vector<1x1x1xf32>
    %c0_i32_41 = arith.constant 0 : i32
    %156 = vector.broadcast %c0_i32_41 : i32 to vector<4x128xi32>
    %157 = arith.cmpi eq, %83, %156 : vector<4x128xi32>
    %c1_i32_42 = arith.constant 1 : i32
    %158 = vector.broadcast %c1_i32_42 : i32 to vector<4x128xi32>
    %159 = arith.cmpi eq, %84, %158 : vector<4x128xi32>
    %160 = arith.andi %157, %159 : vector<4x128xi1>
    %cst_43 = arith.constant 0.000000e+00 : f32
    %161 = vector.broadcast %155 : f32 to vector<4x128xf32>
    %162 = vector.broadcast %cst_43 : f32 to vector<4x128xf32>
    %163 = arith.select %160, %161, %162 : vector<4x128xi1>, vector<4x128xf32>
    %164 = arith.addf %147, %163 : vector<4x128xf32>
    %cst_44 = arith.constant 0.000000e+00 : f32
    %165 = vector.broadcast %cst_44 : f32 to vector<1x384xf32>
    %166 = arith.select %149, %73, %165 : vector<1x384xi1>, vector<1x384xf32>
    %167 = vector.shape_cast %166 : vector<1x384xf32> to vector<1x1x384xf32>
    %cst_45 = arith.constant dense<0.000000e+00> : vector<1xf32>
    %168 = vector.multi_reduction <add>, %167, %cst_45 [1, 2] : vector<1x1x384xf32> to vector<1xf32>
    %169 = vector.shape_cast %168 : vector<1xf32> to vector<1x1x1xf32>
    %170 = vector.extract %169[0, 0, 0] : f32 from vector<1x1x1xf32>
    %c1_i32_46 = arith.constant 1 : i32
    %171 = vector.broadcast %c1_i32_46 : i32 to vector<4x128xi32>
    %172 = arith.cmpi eq, %83, %171 : vector<4x128xi32>
    %c1_i32_47 = arith.constant 1 : i32
    %173 = vector.broadcast %c1_i32_47 : i32 to vector<4x128xi32>
    %174 = arith.cmpi eq, %84, %173 : vector<4x128xi32>
    %175 = arith.andi %172, %174 : vector<4x128xi1>
    %cst_48 = arith.constant 0.000000e+00 : f32
    %176 = vector.broadcast %170 : f32 to vector<4x128xf32>
    %177 = vector.broadcast %cst_48 : f32 to vector<4x128xf32>
    %178 = arith.select %175, %176, %177 : vector<4x128xi1>, vector<4x128xf32>
    %179 = arith.addf %164, %178 : vector<4x128xf32>
    %cst_49 = arith.constant 0.000000e+00 : f32
    %180 = vector.broadcast %cst_49 : f32 to vector<1x384xf32>
    %181 = arith.select %149, %77, %180 : vector<1x384xi1>, vector<1x384xf32>
    %182 = vector.shape_cast %181 : vector<1x384xf32> to vector<1x1x384xf32>
    %cst_50 = arith.constant dense<0.000000e+00> : vector<1xf32>
    %183 = vector.multi_reduction <add>, %182, %cst_50 [1, 2] : vector<1x1x384xf32> to vector<1xf32>
    %184 = vector.shape_cast %183 : vector<1xf32> to vector<1x1x1xf32>
    %185 = vector.extract %184[0, 0, 0] : f32 from vector<1x1x1xf32>
    %c2_i32_51 = arith.constant 2 : i32
    %186 = vector.broadcast %c2_i32_51 : i32 to vector<4x128xi32>
    %187 = arith.cmpi eq, %83, %186 : vector<4x128xi32>
    %c1_i32_52 = arith.constant 1 : i32
    %188 = vector.broadcast %c1_i32_52 : i32 to vector<4x128xi32>
    %189 = arith.cmpi eq, %84, %188 : vector<4x128xi32>
    %190 = arith.andi %187, %189 : vector<4x128xi1>
    %cst_53 = arith.constant 0.000000e+00 : f32
    %191 = vector.broadcast %185 : f32 to vector<4x128xf32>
    %192 = vector.broadcast %cst_53 : f32 to vector<4x128xf32>
    %193 = arith.select %190, %191, %192 : vector<4x128xi1>, vector<4x128xf32>
    %194 = arith.addf %179, %193 : vector<4x128xf32>
    %cst_54 = arith.constant 0.000000e+00 : f32
    %195 = vector.broadcast %cst_54 : f32 to vector<1x384xf32>
    %196 = arith.select %149, %82, %195 : vector<1x384xi1>, vector<1x384xf32>
    %197 = vector.shape_cast %196 : vector<1x384xf32> to vector<1x1x384xf32>
    %cst_55 = arith.constant dense<0.000000e+00> : vector<1xf32>
    %198 = vector.multi_reduction <add>, %197, %cst_55 [1, 2] : vector<1x1x384xf32> to vector<1xf32>
    %199 = vector.shape_cast %198 : vector<1xf32> to vector<1x1x1xf32>
    %200 = vector.extract %199[0, 0, 0] : f32 from vector<1x1x1xf32>
    %c3_i32_56 = arith.constant 3 : i32
    %201 = vector.broadcast %c3_i32_56 : i32 to vector<4x128xi32>
    %202 = arith.cmpi eq, %83, %201 : vector<4x128xi32>
    %c1_i32_57 = arith.constant 1 : i32
    %203 = vector.broadcast %c1_i32_57 : i32 to vector<4x128xi32>
    %204 = arith.cmpi eq, %84, %203 : vector<4x128xi32>
    %205 = arith.andi %202, %204 : vector<4x128xi1>
    %cst_58 = arith.constant 0.000000e+00 : f32
    %206 = vector.broadcast %200 : f32 to vector<4x128xf32>
    %207 = vector.broadcast %cst_58 : f32 to vector<4x128xf32>
    %208 = arith.select %205, %206, %207 : vector<4x128xi1>, vector<4x128xf32>
    %209 = arith.addf %194, %208 : vector<4x128xf32>
    %c2_i32_59 = arith.constant 2 : i32
    %210 = vector.broadcast %c2_i32_59 : i32 to vector<1x384xi32>
    %211 = arith.cmpi eq, %22, %210 : vector<1x384xi32>
    %cst_60 = arith.constant 0.000000e+00 : f32
    %212 = vector.broadcast %cst_60 : f32 to vector<1x384xf32>
    %213 = arith.select %211, %68, %212 : vector<1x384xi1>, vector<1x384xf32>
    %214 = vector.shape_cast %213 : vector<1x384xf32> to vector<1x1x384xf32>
    %cst_61 = arith.constant dense<0.000000e+00> : vector<1xf32>
    %215 = vector.multi_reduction <add>, %214, %cst_61 [1, 2] : vector<1x1x384xf32> to vector<1xf32>
    %216 = vector.shape_cast %215 : vector<1xf32> to vector<1x1x1xf32>
    %217 = vector.extract %216[0, 0, 0] : f32 from vector<1x1x1xf32>
    %c0_i32_62 = arith.constant 0 : i32
    %218 = vector.broadcast %c0_i32_62 : i32 to vector<4x128xi32>
    %219 = arith.cmpi eq, %83, %218 : vector<4x128xi32>
    %c2_i32_63 = arith.constant 2 : i32
    %220 = vector.broadcast %c2_i32_63 : i32 to vector<4x128xi32>
    %221 = arith.cmpi eq, %84, %220 : vector<4x128xi32>
    %222 = arith.andi %219, %221 : vector<4x128xi1>
    %cst_64 = arith.constant 0.000000e+00 : f32
    %223 = vector.broadcast %217 : f32 to vector<4x128xf32>
    %224 = vector.broadcast %cst_64 : f32 to vector<4x128xf32>
    %225 = arith.select %222, %223, %224 : vector<4x128xi1>, vector<4x128xf32>
    %226 = arith.addf %209, %225 : vector<4x128xf32>
    %cst_65 = arith.constant 0.000000e+00 : f32
    %227 = vector.broadcast %cst_65 : f32 to vector<1x384xf32>
    %228 = arith.select %211, %73, %227 : vector<1x384xi1>, vector<1x384xf32>
    %229 = vector.shape_cast %228 : vector<1x384xf32> to vector<1x1x384xf32>
    %cst_66 = arith.constant dense<0.000000e+00> : vector<1xf32>
    %230 = vector.multi_reduction <add>, %229, %cst_66 [1, 2] : vector<1x1x384xf32> to vector<1xf32>
    %231 = vector.shape_cast %230 : vector<1xf32> to vector<1x1x1xf32>
    %232 = vector.extract %231[0, 0, 0] : f32 from vector<1x1x1xf32>
    %c1_i32_67 = arith.constant 1 : i32
    %233 = vector.broadcast %c1_i32_67 : i32 to vector<4x128xi32>
    %234 = arith.cmpi eq, %83, %233 : vector<4x128xi32>
    %c2_i32_68 = arith.constant 2 : i32
    %235 = vector.broadcast %c2_i32_68 : i32 to vector<4x128xi32>
    %236 = arith.cmpi eq, %84, %235 : vector<4x128xi32>
    %237 = arith.andi %234, %236 : vector<4x128xi1>
    %cst_69 = arith.constant 0.000000e+00 : f32
    %238 = vector.broadcast %232 : f32 to vector<4x128xf32>
    %239 = vector.broadcast %cst_69 : f32 to vector<4x128xf32>
    %240 = arith.select %237, %238, %239 : vector<4x128xi1>, vector<4x128xf32>
    %241 = arith.addf %226, %240 : vector<4x128xf32>
    %cst_70 = arith.constant 0.000000e+00 : f32
    %242 = vector.broadcast %cst_70 : f32 to vector<1x384xf32>
    %243 = arith.select %211, %77, %242 : vector<1x384xi1>, vector<1x384xf32>
    %244 = vector.shape_cast %243 : vector<1x384xf32> to vector<1x1x384xf32>
    %cst_71 = arith.constant dense<0.000000e+00> : vector<1xf32>
    %245 = vector.multi_reduction <add>, %244, %cst_71 [1, 2] : vector<1x1x384xf32> to vector<1xf32>
    %246 = vector.shape_cast %245 : vector<1xf32> to vector<1x1x1xf32>
    %247 = vector.extract %246[0, 0, 0] : f32 from vector<1x1x1xf32>
    %c2_i32_72 = arith.constant 2 : i32
    %248 = vector.broadcast %c2_i32_72 : i32 to vector<4x128xi32>
    %249 = arith.cmpi eq, %83, %248 : vector<4x128xi32>
    %c2_i32_73 = arith.constant 2 : i32
    %250 = vector.broadcast %c2_i32_73 : i32 to vector<4x128xi32>
    %251 = arith.cmpi eq, %84, %250 : vector<4x128xi32>
    %252 = arith.andi %249, %251 : vector<4x128xi1>
    %cst_74 = arith.constant 0.000000e+00 : f32
    %253 = vector.broadcast %247 : f32 to vector<4x128xf32>
    %254 = vector.broadcast %cst_74 : f32 to vector<4x128xf32>
    %255 = arith.select %252, %253, %254 : vector<4x128xi1>, vector<4x128xf32>
    %256 = arith.addf %241, %255 : vector<4x128xf32>
    %cst_75 = arith.constant 0.000000e+00 : f32
    %257 = vector.broadcast %cst_75 : f32 to vector<1x384xf32>
    %258 = arith.select %211, %82, %257 : vector<1x384xi1>, vector<1x384xf32>
    %259 = vector.shape_cast %258 : vector<1x384xf32> to vector<1x1x384xf32>
    %cst_76 = arith.constant dense<0.000000e+00> : vector<1xf32>
    %260 = vector.multi_reduction <add>, %259, %cst_76 [1, 2] : vector<1x1x384xf32> to vector<1xf32>
    %261 = vector.shape_cast %260 : vector<1xf32> to vector<1x1x1xf32>
    %262 = vector.extract %261[0, 0, 0] : f32 from vector<1x1x1xf32>
    %c3_i32_77 = arith.constant 3 : i32
    %263 = vector.broadcast %c3_i32_77 : i32 to vector<4x128xi32>
    %264 = arith.cmpi eq, %83, %263 : vector<4x128xi32>
    %c2_i32_78 = arith.constant 2 : i32
    %265 = vector.broadcast %c2_i32_78 : i32 to vector<4x128xi32>
    %266 = arith.cmpi eq, %84, %265 : vector<4x128xi32>
    %267 = arith.andi %264, %266 : vector<4x128xi1>
    %cst_79 = arith.constant 0.000000e+00 : f32
    %268 = vector.broadcast %262 : f32 to vector<4x128xf32>
    %269 = vector.broadcast %cst_79 : f32 to vector<4x128xf32>
    %270 = arith.select %267, %268, %269 : vector<4x128xi1>, vector<4x128xf32>
    %271 = arith.addf %256, %270 : vector<4x128xf32>
    %c0_80 = arith.constant 0 : index
    %c0_81 = arith.constant 0 : index
    %c0_82 = arith.constant 0 : index
    %c0_83 = arith.constant 0 : index
    %272 = vector.load %arg4[%c0_80, %c0_81, %c0_82, %c0_83] : memref<1x1x4x128xf32, #tpu.memory_space<vmem>>, vector<1x1x4x128xf32>
    %273 = vector.shape_cast %272 : vector<1x1x4x128xf32> to vector<4x128xf32>
    %274 = vector.shape_cast %271 : vector<4x128xf32> to vector<1x1x4x128xf32>
    tpu.vector_store %arg4[%c0_80, %c0_81, %c0_82, %c0_83], %274 {strides = array<i32>} : memref<1x1x4x128xf32, #tpu.memory_space<vmem>>, vector<1x1x4x128xf32>,
    return
  }
  func.func @transform_0(%arg0: i32, %arg1: i32) -> (i32, i32) {
    %c0_i32 = arith.constant 0 : i32
    return %arg0, %arg1 : i32, i32
  }
  func.func @transform_1(%arg0: i32, %arg1: i32) -> (i32, i32) {
    %c0_i32 = arith.constant 0 : i32
    return %arg0, %arg1 : i32, i32
  }
  func.func @transform_2(%arg0: i32, %arg1: i32) -> (i32, i32, i32, i32) {
    %c0_i32 = arith.constant 0 : i32
    %c0_i32_0 = arith.constant 0 : i32
    %c0_i32_1 = arith.constant 0 : i32
    return %arg0, %arg1, %c0_i32, %c0_i32_0 : i32, i32, i32, i32
  }
}

</mosaic_0001>

<bundles_post_ra>
// kernel: tpu_custom_call.1
= control target key start
LH: loop header
LB: loop body
LE: loop exit
PB: predicated region body
PF: predicated region fallthrough
CT: control target
= control target key end

     0   :  { %7 = vsyncpa [#allocation3], 0  ;;  %s1776_s0 = inlined_call_operand.hbm [shape: f32[16,300], index: 0, kind: input, shape index: {}]   ;;  %s1777_s1 = inlined_call_operand.hbm [shape: f32[16,300], index: 1, kind: input, shape index: {}]   ;;  %s1778_s2 = inlined_call_operand.hbm [shape: f32[2,1,4,128], index: 2, kind: output, shape index: {}]  }
   0x1   :  { %9 = vsyncpa [#allocation3 + $0x1], 0 }
   0x2   :  { %10 = vsyncpa [#allocation6], 0 }
   0x3   :  { %12 = vsyncpa [#allocation6 + $0x1], 0 }
   0x4   :  { %13 = vsyncpa [#allocation4], 0 }
   0x5   :  { %15 = vsyncpa [#allocation4 + $0x1], 0  ;;  %s1215_s9 = smov 0   ;;  %s1217_s10 = smov 0  }
   0x6   :  { %s1219_s11 = smov 0   ;;  %s1221_s12 = smov 0  }
   0x7   :  { %s1223_s13 = smov 0   ;;  %s1225_s14 = smov 0  }
   0x8 LB: > { %s902_s15 = sadd.s32 4294967295, %s1194_s14   ;;  %s903_s16 = sadd.s32 4294967294, %s1194_s14   ;;  %s1194_s14 = sphi %s1225_s14, %s21_s14   ;;  %s1190_s13 = sphi %s1223_s13, %s1805_s13   ;;  %s1186_s12 = sphi %s1221_s12, %s1804_s12   ;;  %s1182_s11 = sphi %s1219_s11, %s1803_s11   ;;  %s1178_s10 = sphi %s1217_s10, %s1802_s10   ;;  %s1174_s9 = sphi %s1215_s9, %s1801_s9  }
   0x9   : > { %s33_s17 = sadd.s32 1, %s1190_s13  ;;  %s42_s18 = sadd.s32 1, %s1182_s11 }
   0xa   : > { %p35_p0 = scmp.ge.s32.totalorder %s33_s17, 2  ;;  %p49_p1 = scmp.ne.s32.totalorder %s1182_s11, %s1178_s10 }
   0xb   : > { %p50_p2 = scmp.eq.s32.totalorder %s1194_s14, 0  ;;  %p55_p3 = scmp.ne.s32.totalorder %s1178_s10, %s1174_s9 }
   0xc   : > { %s1807_s17 = smov (%p35_p0, %s33_s17), 0  ;;  %p56_p5 = scmp.eq.s32.totalorder %s902_s15, 0 }
   0xd   : > { %p1256_p4 = por %p50_p2, %p49_p1  ;;  %s37_s20 = ssub.s32 %s1190_s13, %s1807_s17 }
   0xe   : > { %p109_p6 = scmp.eq.s32.totalorder %s902_s15, 1  ;;  %p40_p7 = scmp.eq.s32.totalorder %s37_s20, 0 }
   0xf   : > { %p1262_p8 = por %p56_p5, %p55_p3  ;;  %p115_p10 = scmp.eq.s32.totalorder %s903_s16, 1 }
  0x10   : > { %p1266_p9 = por %p109_p6, %p49_p1  ;;  %p973_p13 = scmp.lt.s32.totalorder %s1194_s14, 2 }
  0x11   : > { %s1782_s21 = scalar_select %p1262_p8, 1, 0 }
  0x12   : > { %s1783_s22 = scalar_select %p1266_p9, 1, 0 }
  0x13   : > { %s1271_s23 = scalar_select %p40_p7, %s1182_s11, %s42_s18  }
  0x14   : > { %p1273_p11 = por %p115_p10, %p55_p3  ;;  %s1280_s25 = sand.u32 1, %s1182_s11  }
  0x15   : > { %s921_s26 = smul.u32 24, %s1280_s25  ;;  %p1286_p0 = pnand %p973_p13, %p1256_p4 }
  0x16   : > { %s1784_s24 = scalar_select %p1273_p11, 1, 0 }
  0x17   : > { %s922_s27 = smul.u32 384, %s1190_s13  ;;  %s139_s4 = scalar_lea.vmem [#allocation2], %s921_s26 }
  0x18   : > { %s149_s5 = sshll.u32 %s139_s4, 4  ;;  %s136_s6 = scalar_lea.sflag [#allocation3], %s1280_s25  ;;  %s1300_s5 = int_to_ptr.vmem [resolvable:$true] %s149_s5 }
  0x19   : > { %s1296_s3 = scalar_lea.hbm %s1776_s0, %s922_s27  ;;  %p1050_p3 = pneg %p1286_p0 }
  0x1a   : > { %s1048_s7 = scalar_lea.hbm %s1296_s3, 384  ;;  %s1053_s16 = scalar_lea.hbm %s1776_s0, 768 }
  0x1b   : > { %p1049_p2 = scmp.ne.s32.totalorder %s1296_s3, %s1048_s7  ;;  %p1054_p6 = scmp.lt.u32.totalorder %s1296_s3, %s1776_s0 }
  0x1c   : > { %p1055_p7 = scmp.lt.u32.totalorder %s1053_s16, %s1048_s7  ;;  %p1057_p13 = scmp.lt.u32.totalorder %s1048_s7, %s1296_s3 }
  0x1d   : > { %p1051_p4 = pnand %p1050_p3, %p1049_p2 }
  0x1e   : > { %p1056_p10 = por %p1055_p7, %p1054_p6 }
  0x1f   : > { %p1052_p5 = pneg %p1051_p4 }
  0x20   : > { %p1058_p12 = por %p1057_p13, %p1056_p10 }
  0x22   : > { %p1059_p1 = pnand %p1058_p12, %p1052_p5 }
  0x24   : > { %1062 = shalt.err (!%p1059_p1)
}
  0x25   : > { %s1063_s20 = scalar_lea.vmem %s1300_s5, 384  ;;  %s1196_s29 = smov [#allocation2]  }
  0x26   : > { %p1064_p2 = scmp.ne.s32.totalorder %s1300_s5, %s1063_s20  ;;  %s1068_s30 = sshll.u32 %s1196_s29, 4  ;;  %s1069_s30 = int_to_ptr.vmem [resolvable:$false] %s1068_s30 }
  0x27   : > { %s1070_s4 = scalar_lea.vmem %s1069_s30, 768  ;;  %p1071_p9 = scmp.lt.s32.totalorder %s1300_s5, %s1069_s30 }
  0x28   : > { %p1066_p4 = pnand %p1064_p2, %p1050_p3  ;;  %p1072_p6 = scmp.lt.s32.totalorder %s1070_s4, %s1063_s20 }
  0x2a   : > { %p1067_p11 = pneg %p1066_p4  ;;  %p1073_p7 = por %p1072_p6, %p1071_p9 }
  0x2c   : > { %p1074_p10 = pnand %p1073_p7, %p1067_p11 }
  0x2e   : > { %1077 = shalt.err (!%p1074_p10)
}
  0x2f   : > { %965 = dma.hbm_to_vmem [thread:$0]  (!%p1286_p0), %s1296_s3, 384, %s1300_s5, %s136_s6  }
  0x30   : > { %p175_p12 = scmp.lt.s32.totalorder %s1194_s14, 3  ;;  %s1334_s15 = scalar_lea.hbm %s1777_s1, %s922_s27 }
  0x31   : > { %p1786_p9 = scmp.ge.s32.totalorder %s1194_s14, 1  ;;  %s160_s18 = scalar_lea.vmem [#allocation5], %s921_s26 }
  0x32   : > { %s170_s19 = sshll.u32 %s160_s18, 4  ;;  %s157_s3 = scalar_lea.sflag [#allocation6], %s1280_s25  ;;  %s171_s19 = int_to_ptr.vmem [resolvable:$true] %s170_s19 }
  0x33   : > { %p1338_p11 = pnand %p1786_p9, %p175_p12  ;;  %s1078_s5 = scalar_lea.hbm %s1334_s15, 384 }
  0x34   : > { %p1079_p1 = scmp.ne.s32.totalorder %s1334_s15, %s1078_s5  ;;  %s1083_s20 = scalar_lea.hbm %s1777_s1, 768 }
  0x35   : > { %s1787_s16 = scalar_select %p1338_p11, 1, 0 }
  0x36   : > { %p1081_p5 = pnand %p1079_p1, %p1050_p3  ;;  %p1084_p2 = scmp.lt.u32.totalorder %s1334_s15, %s1777_s1 }
  0x37   : > { %p1085_p4 = scmp.lt.u32.totalorder %s1083_s20, %s1078_s5  ;;  %p1087_p7 = scmp.lt.u32.totalorder %s1078_s5, %s1334_s15 }
  0x38   : > { %p1082_p13 = pneg %p1081_p5 }
  0x39   : > { %p1086_p6 = por %p1085_p4, %p1084_p2 }
  0x3b   : > { %p1088_p10 = por %p1087_p7, %p1086_p6 }
  0x3d   : > { %p1089_p12 = pnand %p1088_p10, %p1082_p13 }
  0x3f   : > { %1092 = shalt.err (!%p1089_p12)
}
  0x40   : > { %s1093_s25 = scalar_lea.vmem %s171_s19, 384  ;;  %s1197_s26 = smov [#allocation5]  }
  0x41   : > { %p1094_p9 = scmp.ne.s32.totalorder %s171_s19, %s1093_s25  ;;  %s1098_s4 = sshll.u32 %s1197_s26, 4  ;;  %s1099_s4 = int_to_ptr.vmem [resolvable:$false] %s1098_s4 }
  0x42   : > { %s1100_s7 = scalar_lea.vmem %s1099_s4, 768  ;;  %p1101_p8 = scmp.lt.s32.totalorder %s171_s19, %s1099_s4 }
  0x43   : > { %p1096_p1 = pnand %p1094_p9, %p1050_p3  ;;  %p1102_p11 = scmp.lt.s32.totalorder %s1100_s7, %s1093_s25 }
  0x45   : > { %p1097_p5 = pneg %p1096_p1  ;;  %p1103_p2 = por %p1102_p11, %p1101_p8 }
  0x47   : > { %p1104_p4 = pnand %p1103_p2, %p1097_p5 }
  0x49   : > { %1107 = shalt.err (!%p1104_p4)
}
  0x4a   : > { %968 = dma.hbm_to_vmem [thread:$0]  (!%p1286_p0), %s1334_s15, 384, %s171_s19, %s157_s3  }
  0x4b   : > { %p1788_p13 = scmp.ne.s32.totalorder %s1787_s16, 0 }
  0x4c   : > { %s1367_s8 = sand.u32 (!%p1788_p13), 1, %s1178_s10   ;;  %p1789_p3 = scmp.ne.s32.totalorder (!%p1788_p13), %s1782_s21, 0 }
  0x4d   : > { %179 = sbr.rel (%p1788_p13) target bundleno = 412 (0x19c), region = 28  ;;  %s182_s5 = scalar_lea.sflag (!%p1788_p13), [#allocation3], %s1367_s8 }
  0x4e   : > { %s925_s18 = smul.u32 (!%p1788_p13), 24, %s1367_s8 }
  0x50   : > { %s185_s27 = scalar_lea.vmem (!%p1788_p13), [#allocation2], %s925_s18 }
  0x54   : > { %1161 = dma.done.wait (%p1789_p3), %s182_s5, 384  }
  0x55   : > { %1163 = vsyncadd (%p1789_p3), %s182_s5, 4294966912  ;;  %s191_s28 = scalar_lea.sflag [#allocation6], %s1367_s8  ;;  %s194_s15 = scalar_lea.vmem [#allocation5], %s925_s18 }
  0x56   : > { %1165 = dma.done.wait (%p1789_p3), %s191_s28, 384  }
  0x57   : > { %1167 = vsyncadd (%p1789_p3), %s191_s28, 4294966912  ;;  %s910_s16 = sshll.u32 %s1186_s12, 3  ;;  %v224_v0 = vlaneseq  ;;  %v286_v13 = vld [vmem:[%s185_s27] sm:$0xff]  ;;  %v287_v14 = vld [vmem:[%s185_s27 + $0x8] sm:$0xff]  ;;  %v1198_v56 = vmov 0.0   ;;  %s909_s4 = sshll.u32 %s1367_s8, 2 }
  0x58   : > { %v297_v3 = vstv %s910_s16  ;;  %v288_v15 = vld [vmem:[%s185_s27 + $0x10] sm:$0xff]  ;;  %v292_v18 = vld [vmem:[%s194_s15 + $0x8] sm:$0xff]  ;;  %v293_v19 = vld [vmem:[%s194_s15 + $0x10] sm:$0xff]  ;;  %v1402_v20 = vadd.f32 1e-06, %v286_v13  ;;  %s918_s27 = sshll.u32 %s1186_s12, 6 }
  0x59   : > { %v1381_v1 = vand.u32 127, %v224_v0  ;;  %v1383_v2 = vshrl.u32 %v224_v0, 7  ;;  %v291_v17 = vld [vmem:[%s194_s15] sm:$0xff]  ;;  %vm312_vm4 = vcmp.eq.f32.partialorder %v292_v18, %v292_v18  ;;  %vm313_vm5 = vcmp.eq.f32.partialorder %v293_v19, %v293_v19  ;;  %s219_s28 = scalar_lea.vmem [#allocation7], %s909_s4  ;;  %p1798_p0 = scmp.ne.s32.totalorder %s1783_s22, 0 }
  0x5a   : > { %vm311_vm3 = vcmp.eq.f32.partialorder %v291_v17, %v291_v17  ;;  %v317_v22 = vsub.f32 %v286_v13, %v291_v17  ;;  %v318_v26 = vsub.f32 %v287_v14, %v292_v18  ;;  %v319_v29 = vsub.f32 %v288_v15, %v293_v19  ;;  %s794_s15 = sshll.u32 %s219_s28, 4  ;;  %s1199_s12 = smov [#allocation7]   ;;  %s1729_s15 = int_to_ptr.vmem [resolvable:$true] %s794_s15 }
  0x5b   : > { %v226_v4 = vadd.s32 128, %v1381_v1  ;;  %v227_v5 = vadd.s32 256, %v1381_v1  ;;  %v1388_v6 = vmul.u32.u64.low 2863311531, %v1381_v1  ;;  %v1389_v7 = vmul.u32.u64.high 2863311531, %v1381_v1, %v1388_v6 }
  0x5c   : > { %v1392_v8 = vadd.s32 %v297_v3, %v1383_v2  ;;  %v1425_v30 = vadd.f32 1e-06, %v287_v14  ;;  %v1427_v31 = vadd.f32 1e-06, %v288_v15  ;;  %1024 = vrsqrt.f32 %v1402_v20 }
  0x5d   : > { %vm234_vm0 = vcmp.lt.s32.totalorder %v227_v5, 300  ;;  %v1394_v9 = vmul.u32.u64.low 2863311531, %v226_v4  ;;  %v1395_v10 = vmul.u32.u64.high 2863311531, %v226_v4, %v1394_v9  ;;  %v241_v16 = vshrl.u32 %v1389_v7, 1 }
  0x5e   : > { %v1397_v11 = vmul.u32.u64.low 2863311531, %v227_v5  ;;  %v1398_v12 = vmul.u32.u64.high 2863311531, %v227_v5, %v1397_v11  ;;  %vm299_vm1 = vcmp.lt.s32.totalorder %v1392_v8, 16  ;;  %1026 = vrsqrt.f32 %v1425_v30 }
  0x5f   : > { %vm1407_vm2 = vmand %vm299_vm1, %vm234_vm0  ;;  %v242_v23 = vmul.u32 3, %v241_v16  ;;  %v252_v24 = vshrl.u32 %v1395_v10, 1  ;;  %v1442_v38 = vadd.f32 1e-06, %v291_v17  ;;  %1028 = vrsqrt.f32 %v1427_v31 }
  0x60   : > { %vm1414_vm6 = vmand %vm299_vm1, %vm311_vm3  ;;  %v263_v27 = vshrl.u32 %v1398_v12, 1  ;;  %v1447_v43 = vadd.f32 1e-06, %v292_v18  ;;  %v1449_v45 = vadd.f32 1e-06, %v293_v19 }
  0x61   : > { %vm1421_vm7 = vmand %vm299_vm1, %vm312_vm4  ;;  %v243_v32 = vsub.s32 %v1381_v1, %v242_v23  ;;  %v253_v33 = vmul.u32 3, %v252_v24  ;;  %v320_v35 = vsel %vm1414_vm6, %v317_v22, 0.0  ;;  %1030 = vrsqrt.f32 %v1442_v38 }
  0x62   : > { %vm1432_vm8 = vmand %vm1407_vm2, %vm313_vm5  ;;  %v264_v36 = vmul.u32 3, %v263_v27  ;;  %v321_v37 = vsel %vm1421_vm7, %v318_v26, 0.0  ;;  %v407_v49 = vmul.f32 %v320_v35, %v320_v35  ;;  %1032 = vrsqrt.f32 %v1447_v43 }
  0x63   : > { %v254_v39 = vsub.s32 %v226_v4, %v253_v33  ;;  %vm268_vm9 = vcmp.ne.s32.totalorder %v243_v32, 0  ;;  %vm271_vm10 = vcmp.lt.s32.totalorder %v243_v32, 0  ;;  %v277_v40 = vadd.s32 3, %v243_v32 }
  0x64   : > { %v265_v41 = vsub.s32 %v227_v5, %v264_v36  ;;  %vm274_vm11 = vmand %vm271_vm10, %vm268_vm9  ;;  %v322_v42 = vsel %vm1432_vm8, %v319_v29, 0.0  ;;  %v408_v50 = vmul.f32 %v321_v37, %v321_v37  ;;  %1034 = vrsqrt.f32 %v1449_v45 }
  0x65   : > { %vm269_vm12 = vcmp.ne.s32.totalorder %v254_v39, 0  ;;  %vm272_vm13 = vcmp.lt.s32.totalorder %v254_v39, 0  ;;  %v278_v44 = vadd.s32 3, %v254_v39  ;;  %v1451_v47 = vsel %vm274_vm11, %v277_v40, %v243_v32 }
  0x66   : > { %vm270_vm14 = vcmp.ne.s32.totalorder %v265_v41, 0  ;;  %vm273_vm15 = vcmp.lt.s32.totalorder %v265_v41, 0  ;;  %vm275_vm0 = vmand %vm272_vm13, %vm269_vm12  ;;  %v279_v46 = vadd.s32 3, %v265_v41  ;;  %v409_v52 = vmul.f32 %v322_v42, %v322_v42  ;;  %v1025_v60 = vpop.eup %1024 }
  0x67   : > { %vm276_vm3 = vmand %vm273_vm15, %vm270_vm14  ;;  %v1453_v48 = vsel %vm275_vm0, %v278_v44, %v254_v39  ;;  %v410_v53 = vrot.slane %v407_v49, 4  ;;  %v416_v54 = vrot.slane %v408_v50, 4  ;;  %vm509_vm4 = vcmp.eq.s32.totalorder %v1451_v47, 0 }
  0x68   : > { %v1456_v51 = vsel %vm276_vm3, %v279_v46, %v265_v41  ;;  %v422_v55 = vrot.slane %v409_v52, 4  ;;  %vm510_vm5 = vcmp.eq.s32.totalorder %v1453_v48, 0  ;;  %v911_v57 = vsel %vm1414_vm6, 1.0, %v1198_v56  ;;  %v1027_v3 = vpop.eup %1026 }
  0x69   : > { %v912_v58 = vsel %vm1421_vm7, 1.0, %v1198_v56  ;;  %v913_v59 = vsel %vm1432_vm8, 1.0, %v1198_v56  ;;  %v411_v61 = vadd.f32 %v410_v53, %v407_v49  ;;  %v417_v62 = vadd.f32 %v416_v54, %v408_v50  ;;  %v1029_v12 = vpop.eup %1028 }
  0x6a   : > { %vm511_vm9 = vcmp.eq.s32.totalorder %v1456_v51, 0  ;;  %vm515_vm10 = vcmask 1040384   ;;  %v437_v63 = vrot.slane %v911_v57, 4  ;;  %v443_v0 = vrot.slane %v912_v58, 4 }
  0x6b   : > { %v423_v4 = vadd.f32 %v422_v55, %v409_v52  ;;  %v449_v5 = vrot.slane %v913_v59, 4  ;;  %v327_v6 = vmul.f32 %v1025_v60, %v1402_v20  ;;  %vm328_vm6 = vcmp.eq.f32.partialorder %v1402_v20, inf  ;;  %v1031_v26 = vpop.eup %1030 }
  0x6c   : > { %v412_v7 = vrot.slane %v411_v61, 2  ;;  %v418_v9 = vrot.slane %v417_v62, 2  ;;  %v438_v10 = vadd.f32 %v911_v57, %v437_v63  ;;  %v444_v11 = vadd.f32 %v912_v58, %v443_v0  ;;  %v1033_v33 = vpop.eup %1032 }
  0x6d   : > { %v424_v13 = vrot.slane %v423_v4, 2  ;;  %v450_v14 = vadd.f32 %v913_v59, %v449_v5  ;;  %v329_v15 = vsel %vm328_vm6, %v1402_v20, %v327_v6  ;;  %vm330_vm7 = vcmp.eq.f32.partialorder %v1402_v20, 0.0 }
  0x6e   : > { %v413_v16 = vadd.f32 %v412_v7, %v411_v61  ;;  %v419_v17 = vadd.f32 %v418_v9, %v417_v62  ;;  %v439_v18 = vrot.slane %v438_v10, 2  ;;  %v445_v19 = vrot.slane %v444_v11, 2  ;;  %v1035_v37 = vpop.eup %1034 }
  0x6f   : > { %v425_v22 = vadd.f32 %v424_v13, %v423_v4  ;;  %v451_v23 = vrot.slane %v450_v14, 2  ;;  %v331_v24 = vand.u32 2147483648, %v1402_v20  ;;  %v334_v25 = vmul.f32 %v1027_v3, %v1425_v30 }
  0x70   : > { %v414_v27 = vrot.slane %v413_v16, 1  ;;  %v420_v28 = vrot.slane %v419_v17, 1  ;;  %v440_v29 = vadd.f32 %v439_v18, %v438_v10  ;;  %v446_v32 = vadd.f32 %v445_v19, %v444_v11 }
  0x71   : > { %v426_v34 = vrot.slane %v425_v22, 1  ;;  %v452_v35 = vadd.f32 %v451_v23, %v450_v14  ;;  %v332_v36 = vsel %vm330_vm7, %v331_v24, %v329_v15  ;;  %vm335_vm8 = vcmp.eq.f32.partialorder %v1425_v30, inf }
  0x72   : > { %v1481_v39 = vadd.f32 %v414_v27, %v413_v16  ;;  %v1483_v40 = vadd.f32 %v420_v28, %v419_v17  ;;  %v441_v41 = vrot.slane %v440_v29, 1  ;;  %v447_v42 = vrot.slane %v446_v32, 1 }
  0x73   : > { %v1485_v44 = vadd.f32 %v426_v34, %v425_v22  ;;  %v453_v46 = vrot.slane %v452_v35, 1  ;;  %v336_v49 = vsel %vm335_vm8, %v1425_v30, %v334_v25  ;;  %vm337_vm11 = vcmp.eq.f32.partialorder %v1425_v30, 0.0 }
  0x74   : > { %v512_v20 = vsel %vm509_vm4, %v1481_v39, 0.0  ;;  %v513_v50 = vsel %vm510_vm5, %v1483_v40, 0.0  ;;  %v1495_v52 = vadd.f32 %v441_v41, %v440_v29  ;;  %v1497_v53 = vadd.f32 %v447_v42, %v446_v32 }
  0x75   : > { %v514_v54 = vsel %vm511_vm9, %v1485_v44, 0.0  ;;  %v516_v55 = vsel %vm515_vm10, %v512_v20, 0.0  ;;  %v517_v57 = vsel %vm515_vm10, %v513_v50, 0.0  ;;  %v1504_v58 = vadd.f32 %v453_v46, %v452_v35 }
  0x76   : > { %v518_v59 = vadd.f32 %v517_v57, %v516_v55  ;;  %v519_v60 = vsel %vm515_vm10, %v514_v54, 0.0  ;;  %v536_v61 = vsel %vm509_vm4, %v1495_v52, 0.0  ;;  %v537_v62 = vsel %vm510_vm5, %v1497_v53, 0.0 }
  0x77   : > { %v538_v63 = vsel %vm511_vm9, %v1504_v58, 0.0  ;;  %v539_v0 = vsel %vm515_vm10, %v536_v61, 0.0  ;;  %v540_v3 = vsel %vm515_vm10, %v537_v62, 0.0  ;;  %v338_v4 = vand.u32 2147483648, %v1425_v30 }
  0x78   : > { %v520_v5 = vadd.f32 %v519_v60, %v518_v59  ;;  %v541_v6 = vadd.f32 %v540_v3, %v539_v0  ;;  %v542_v7 = vsel %vm515_vm10, %v538_v63, 0.0  ;;  %v341_v9 = vmul.f32 %v1029_v12, %v1427_v31 }
  0x79   : > { %v339_v10 = vsel %vm337_vm11, %v338_v4, %v336_v49  ;;  %vm342_vm12 = vcmp.eq.f32.partialorder %v1427_v31, inf  ;;  %vm344_vm13 = vcmp.eq.f32.partialorder %v1427_v31, 0.0  ;;  %v345_v11 = vand.u32 2147483648, %v1427_v31 }
  0x7a   : > { %521 = vadd.xlane.f32.xlu0 %v520_v5  ;;  %v543_v13 = vadd.f32 %v542_v7, %v541_v6  ;;  %v343_v14 = vsel %vm342_vm12, %v1427_v31, %v341_v9  ;;  %v347_v15 = vadd.f32 0.1, %v332_v36  ;;  %v348_v16 = vadd.f32 0.1, %v339_v10 }
  0x7b   : > { %v346_v17 = vsel %vm344_vm13, %v345_v11, %v343_v14  ;;  %v363_v18 = vmul.f32 %v1031_v26, %v1442_v38  ;;  %vm364_vm14 = vcmp.eq.f32.partialorder %v1442_v38, inf  ;;  %vm366_vm15 = vcmp.eq.f32.partialorder %v1442_v38, 0.0 }
  0x7c   : > { %v349_v30 = vadd.f32 0.1, %v346_v17  ;;  %1036 = vlog2.f32 %v347_v15  ;;  %v367_v12 = vand.u32 2147483648, %v1442_v38  ;;  %v370_v19 = vmul.f32 %v1033_v33, %v1447_v43 }
  0x7d   : > { %1038 = vlog2.f32 %v348_v16  ;;  %v365_v22 = vsel %vm364_vm14, %v1442_v38, %v363_v18  ;;  %vm371_vm0 = vcmp.eq.f32.partialorder %v1447_v43, inf  ;;  %vm373_vm3 = vcmp.eq.f32.partialorder %v1447_v43, 0.0 }
  0x7e   : > { %544 = vadd.xlane.f32.xlu0 %v543_v13  ;;  %1040 = vlog2.f32 %v349_v30  ;;  %v368_v31 = vsel %vm366_vm15, %v367_v12, %v365_v22  ;;  %v372_v23 = vsel %vm371_vm0, %v1447_v43, %v370_v19  ;;  %v374_v24 = vand.u32 2147483648, %v1447_v43 }
  0x7f   : > { %v377_v25 = vmul.f32 %v1035_v37, %v1449_v45  ;;  %vm378_vm6 = vcmp.eq.f32.partialorder %v1449_v45, inf  ;;  %vm380_vm7 = vcmp.eq.f32.partialorder %v1449_v45, 0.0  ;;  %v381_v26 = vand.u32 2147483648, %v1449_v45 }
  0x80   : > { %v375_v38 = vsel %vm373_vm3, %v374_v24, %v372_v23  ;;  %v383_v27 = vadd.f32 0.1, %v368_v31  ;;  %vm602_vm8 = vcmp.eq.s32.totalorder %v1451_v47, 1  ;;  %vm603_vm11 = vcmp.eq.s32.totalorder %v1453_v48, 1 }
  0x81   : > { %v379_v28 = vsel %vm378_vm6, %v1449_v45, %v377_v25  ;;  %v384_v29 = vadd.f32 0.1, %v375_v38  ;;  %vm604_vm12 = vcmp.eq.s32.totalorder %v1456_v51, 1  ;;  %v605_v43 = vsel %vm602_vm8, %v1481_v39, 0.0 }
  0x82   : > { %v382_v32 = vsel %vm380_vm7, %v381_v26, %v379_v28  ;;  %1042 = vlog2.f32 %v383_v27  ;;  %v606_v33 = vsel %vm603_vm11, %v1483_v40, 0.0  ;;  %v607_v34 = vsel %vm604_vm12, %v1485_v44, 0.0 }
  0x83   : > { %v385_v35 = vadd.f32 0.1, %v382_v32  ;;  %1044 = vlog2.f32 %v384_v29  ;;  %v608_v45 = vsel %vm515_vm10, %v605_v43, 0.0  ;;  %v609_v36 = vsel %vm515_vm10, %v606_v33, 0.0 }
  0x84   : > { %v610_v37 = vadd.f32 %v609_v36, %v608_v45  ;;  %v611_v41 = vsel %vm515_vm10, %v607_v34, 0.0  ;;  %v627_v4 = vsel %vm602_vm8, %v1495_v52, 0.0  ;;  %v628_v13 = vsel %vm603_vm11, %v1497_v53, 0.0 }
  0x85   : > { %1046 = vlog2.f32 %v385_v35  ;;  %v629_v16 = vsel %vm604_vm12, %v1504_v58, 0.0  ;;  %v630_v17 = vsel %vm515_vm10, %v627_v4, 0.0  ;;  %v631_v31 = vsel %vm515_vm10, %v628_v13, 0.0 }
  0x86   : > { %v1037_v42 = vpop.eup %1036  ;;  %v612_v46 = vadd.f32 %v611_v41, %v610_v37  ;;  %v1579_v37 = vadd.f32 %v631_v31, %v630_v17  ;;  %vm692_vm7 = vcmp.eq.s32.totalorder %v1456_v51, 2 }
  0x87   : > { %v1039_v49 = vpop.eup %1038  ;;  %v351_v50 = vmul.f32 0.6931472, %v1037_v42 }
  0x88   : > { %v1041_v20 = vpop.eup %1040  ;;  %613 = vadd.xlane.f32.xlu0 %v612_v46  ;;  %v353_v54 = vmul.f32 0.6931472, %v1039_v49 }
  0x89   : > { %v355_v57 = vmul.f32 0.6931472, %v1041_v20  ;;  %v356_v60 = vmul.f32 0.4342945, %v351_v50 }
  0x8a   : > { %v357_v62 = vmul.f32 0.4342945, %v353_v54 }
  0x8b   : > { %v358_v5 = vmul.f32 0.4342945, %v355_v57 }
  0x8c   : > { %v1043_v55 = vpop.eup %1042 }
  0x8d   : > { %v1045_v59 = vpop.eup %1044  ;;  %v387_v61 = vmul.f32 0.6931472, %v1043_v55 }
  0x8e   : > { %v389_v63 = vmul.f32 0.6931472, %v1045_v59 }
  0x8f   : > { %v1047_v0 = vpop.eup %1046  ;;  %v392_v3 = vmul.f32 0.4342945, %v387_v61 }
  0x90   : > { %v391_v6 = vmul.f32 0.6931472, %v1047_v0  ;;  %v393_v7 = vmul.f32 0.4342945, %v389_v63  ;;  %v633_v63 = vsel %vm515_vm10, %v629_v16, 0.0  ;;  %v695_v0 = vsel %vm692_vm7, %v1485_v44, 0.0 }
  0x91   : > { %vm395_vm13 = vcmp.eq.f32.partialorder %v392_v3, %v392_v3  ;;  %v401_v9 = vsub.f32 %v356_v60, %v392_v3 }
  0x92   : > { %v394_v10 = vmul.f32 0.4342945, %v391_v6  ;;  %vm396_vm14 = vcmp.eq.f32.partialorder %v393_v7, %v393_v7  ;;  %vm398_vm15 = vmand %vm299_vm1, %vm395_vm13  ;;  %v402_v11 = vsub.f32 %v357_v62, %v393_v7  ;;  %vm597_vm13 = vcmp.eq.s32.totalorder %v1383_v2, 3 }
  0x93   : > { %vm399_vm0 = vmand %vm299_vm1, %vm396_vm14  ;;  %v404_v14 = vsel %vm398_vm15, %v401_v9, 0.0  ;;  %v914_v15 = vsel %vm398_vm15, 1.0, %v1198_v56  ;;  %vm690_vm1 = vcmp.eq.s32.totalorder %v1451_v47, 2  ;;  %vm622_vm14 = vcmp.eq.s32.totalorder %v1381_v1, 1 }
  0x94   : > { %vm397_vm3 = vcmp.eq.f32.partialorder %v394_v10, %v394_v10  ;;  %v403_v18 = vsub.f32 %v358_v5, %v394_v10  ;;  %v405_v30 = vsel %vm399_vm0, %v402_v11, 0.0  ;;  %v458_v12 = vmul.f32 %v404_v14, %v404_v14 }
  0x95   : > { %vm400_vm6 = vmand %vm1407_vm2, %vm397_vm3  ;;  %v459_v19 = vmul.f32 %v405_v30, %v405_v30  ;;  %v915_v8 = vsel %vm399_vm0, 1.0, %v1198_v56  ;;  %v488_v22 = vrot.slane %v914_v15, 4  ;;  %vm691_vm2 = vcmp.eq.s32.totalorder %v1453_v48, 2 }
  0x96   : > { %v406_v23 = vsel %vm400_vm6, %v403_v18, 0.0  ;;  %v461_v24 = vrot.slane %v458_v12, 4  ;;  %v916_v25 = vsel %vm400_vm6, 1.0, %v1198_v56  ;;  %v494_v26 = vrot.slane %v915_v8, 4 }
  0x97   : > { %v460_v38 = vmul.f32 %v406_v23, %v406_v23  ;;  %v467_v27 = vrot.slane %v459_v19, 4  ;;  %v489_v28 = vadd.f32 %v914_v15, %v488_v22  ;;  %v500_v29 = vrot.slane %v916_v25, 4 }
  0x98   : > { %v462_v43 = vadd.f32 %v461_v24, %v458_v12  ;;  %v495_v32 = vadd.f32 %v915_v8, %v494_v26  ;;  %v693_v50 = vsel %vm690_vm1, %v1481_v39, 0.0  ;;  %v694_v54 = vsel %vm691_vm2, %v1483_v40, 0.0 }
  0x99   : > { %v468_v21 = vadd.f32 %v467_v27, %v459_v19  ;;  %v473_v33 = vrot.slane %v460_v38, 4  ;;  %v490_v34 = vrot.slane %v489_v28, 2  ;;  %v501_v35 = vadd.f32 %v916_v25, %v500_v29 }
  0x9a   : > { %v463_v45 = vrot.slane %v462_v43, 2  ;;  %v496_v36 = vrot.slane %v495_v32, 2  ;;  %v696_v40 = vsel %vm515_vm10, %v693_v50, 0.0  ;;  %v697_v9 = vsel %vm515_vm10, %v694_v54, 0.0 }
  0x9b   : > { %v469_v56 = vrot.slane %v468_v21, 2  ;;  %v474_v41 = vadd.f32 %v473_v33, %v460_v38  ;;  %v491_v42 = vadd.f32 %v490_v34, %v489_v28  ;;  %v502_v46 = vrot.slane %v501_v35, 2 }
  0x9c   : > { %v464_v49 = vadd.f32 %v463_v45, %v462_v43  ;;  %v497_v20 = vadd.f32 %v496_v36, %v495_v32  ;;  %v698_v33 = vadd.f32 %v697_v9, %v696_v40  ;;  %v717_v40 = vsel %vm692_vm7, %v1504_v58, 0.0 }
  0x9d   : > { %v470_v55 = vadd.f32 %v469_v56, %v468_v21  ;;  %v475_v57 = vrot.slane %v474_v41, 2  ;;  %v492_v59 = vrot.slane %v491_v42, 1  ;;  %v503_v60 = vadd.f32 %v502_v46, %v501_v35 }
  0x9e   : > { %v465_v61 = vrot.slane %v464_v49, 1  ;;  %v498_v62 = vrot.slane %v497_v20, 1  ;;  %v699_v35 = vsel %vm515_vm10, %v695_v0, 0.0  ;;  %v715_v56 = vsel %vm690_vm1, %v1495_v52, 0.0 }
  0x9f   : > { %v471_v3 = vrot.slane %v470_v55, 1  ;;  %v476_v4 = vadd.f32 %v475_v57, %v474_v41  ;;  %v493_v5 = vadd.f32 %v492_v59, %v491_v42  ;;  %v504_v39 = vrot.slane %v503_v60, 1 }
  0xa0   : > { %v466_v6 = vadd.f32 %v465_v61, %v464_v49  ;;  %v499_v7 = vadd.f32 %v498_v62, %v497_v20  ;;  %v700_v57 = vadd.f32 %v699_v35, %v698_v33  ;;  %v634_v62 = vadd.f32 %v633_v63, %v1579_v37 }
  0xa1   : > { %v472_v10 = vadd.f32 %v471_v3, %v470_v55  ;;  %v477_v11 = vrot.slane %v476_v4, 1  ;;  %v1594_v13 = vadd.f32 %v504_v39, %v503_v60  ;;  %v580_v14 = vsel %vm509_vm4, %v493_v5, 0.0 }
  0xa2   : > { %v558_v44 = vsel %vm509_vm4, %v466_v6, 0.0  ;;  %v581_v15 = vsel %vm510_vm5, %v499_v7, 0.0  ;;  %v583_v16 = vsel %vm515_vm10, %v580_v14, 0.0  ;;  %v648_v17 = vsel %vm602_vm8, %v466_v6, 0.0 }
  0xa3   : > { %v478_v18 = vadd.f32 %v477_v11, %v476_v4  ;;  %v559_v30 = vsel %vm510_vm5, %v472_v10, 0.0  ;;  %v561_v12 = vsel %vm515_vm10, %v558_v44, 0.0  ;;  %v582_v19 = vsel %vm511_vm9, %v1594_v13, 0.0 }
  0xa4   : > { %v562_v8 = vsel %vm515_vm10, %v559_v30, 0.0  ;;  %v584_v22 = vsel %vm515_vm10, %v581_v15, 0.0  ;;  %v586_v31 = vsel %vm515_vm10, %v582_v19, 0.0  ;;  %v649_v23 = vsel %vm603_vm11, %v472_v10, 0.0 }
  0xa5   : > { %v560_v24 = vsel %vm511_vm9, %v478_v18, 0.0  ;;  %v563_v25 = vadd.f32 %v562_v8, %v561_v12  ;;  %v585_v26 = vadd.f32 %v584_v22, %v583_v16  ;;  %v650_v38 = vsel %vm604_vm12, %v478_v18, 0.0 }
  0xa6   : > { %v564_v27 = vsel %vm515_vm10, %v560_v24, 0.0  ;;  %v651_v28 = vsel %vm515_vm10, %v648_v17, 0.0  ;;  %v652_v29 = vsel %vm515_vm10, %v649_v23, 0.0  ;;  %v654_v43 = vsel %vm515_vm10, %v650_v38, 0.0 }
  0xa7   : > { %v565_v32 = vadd.f32 %v564_v27, %v563_v25  ;;  %v653_v21 = vadd.f32 %v652_v29, %v651_v28  ;;  %v669_v34 = vsel %vm602_vm8, %v493_v5, 0.0  ;;  %v670_v45 = vsel %vm603_vm11, %v499_v7, 0.0 }
  0xa8   : > { %v736_v36 = vsel %vm690_vm1, %v466_v6, 0.0  ;;  %v587_v41 = vadd.f32 %v586_v31, %v585_v26  ;;  %v672_v46 = vsel %vm515_vm10, %v669_v34, 0.0  ;;  %v737_v49 = vsel %vm691_vm2, %v472_v10, 0.0 }
  0xa9   : > { %566 = vadd.xlane.f32.xlu1 %v565_v32  ;;  %v655_v42 = vadd.f32 %v654_v43, %v653_v21  ;;  %v673_v20 = vsel %vm515_vm10, %v670_v45, 0.0  ;;  %v738_v50 = vsel %vm692_vm7, %v478_v18, 0.0  ;;  %v739_v54 = vsel %vm515_vm10, %v736_v36, 0.0 }
  0xaa   : > { %v740_v55 = vsel %vm515_vm10, %v737_v49, 0.0  ;;  %v671_v52 = vsel %vm604_vm12, %v1594_v13, 0.0  ;;  %v716_v60 = vsel %vm691_vm2, %v1497_v53, 0.0  ;;  %v742_v61 = vsel %vm515_vm10, %v738_v50, 0.0 }
  0xab   : > { %656 = vadd.xlane.f32.xlu0 %v655_v42  ;;  %v741_v59 = vadd.f32 %v740_v55, %v739_v54  ;;  %v674_v0 = vadd.f32 %v673_v20, %v672_v46  ;;  %v675_v3 = vsel %vm515_vm10, %v671_v52, 0.0  ;;  %v718_v4 = vsel %vm515_vm10, %v715_v56, 0.0 }
  0xac   : > { %v719_v39 = vsel %vm515_vm10, %v716_v60, 0.0  ;;  %v757_v53 = vsel %vm690_vm1, %v493_v5, 0.0  ;;  %v758_v9 = vsel %vm691_vm2, %v499_v7, 0.0  ;;  %v721_v10 = vsel %vm515_vm10, %v717_v40, 0.0  ;;  %vm686_vm1 = vmand %vm597_vm13, %vm622_vm14 }
  0xad   : > { %588 = vadd.xlane.f32.xlu1 %v587_v41  ;;  %v743_v6 = vadd.f32 %v742_v61, %v741_v59  ;;  %v676_v37 = vadd.f32 %v675_v3, %v674_v0  ;;  %v720_v63 = vadd.f32 %v719_v39, %v718_v4  ;;  %v760_v11 = vsel %vm515_vm10, %v757_v53, 0.0 }
  0xae   : > { %v761_v14 = vsel %vm515_vm10, %v758_v9, 0.0  ;;  %v759_v58 = vsel %vm692_vm7, %v1594_v13, 0.0  ;;  %vm530_vm4 = vcmp.eq.s32.totalorder %v1383_v2, 0  ;;  %vm531_vm5 = vcmp.eq.s32.totalorder %v1381_v1, 0 }
  0xaf   : > { %701 = vadd.xlane.f32.xlu0 %v700_v57  ;;  %v722_v47 = vadd.f32 %v721_v10, %v720_v63  ;;  %v762_v5 = vadd.f32 %v761_v14, %v760_v11  ;;  %v763_v48 = vsel %vm515_vm10, %v759_v58, 0.0  ;;  %vm553_vm9 = vcmp.eq.s32.totalorder %v1383_v2, 1  ;;  %vm532_vm10 = vmand %vm530_vm4, %vm531_vm5 }
  0xb0   : > { %vm575_vm8 = vcmp.eq.s32.totalorder %v1383_v2, 2  ;;  %vm554_vm11 = vmand %vm553_vm9, %vm531_vm5  ;;  %vm710_vm2 = vcmp.eq.s32.totalorder %v1381_v1, 2 }
  0xb1   : > { %635 = vadd.xlane.f32.xlu1 %v634_v62  ;;  %v764_v7 = vadd.f32 %v763_v48, %v762_v5  ;;  %vm576_vm12 = vmand %vm575_vm8, %vm531_vm5 }
  0xb2   : > { %vm598_vm15 = vmand %vm597_vm13, %vm531_vm5 }
  0xb3   : > { %744 = vadd.xlane.f32.xlu0 %v743_v6  ;;  %vm623_vm0 = vmand %vm530_vm4, %vm622_vm14 }
  0xb4   : > { %vm644_vm3 = vmand %vm553_vm9, %vm622_vm14 }
  0xb5   : > { %677 = vadd.xlane.f32.xlu1 %v676_v37  ;;  %vm665_vm6 = vmand %vm575_vm8, %vm622_vm14 }
  0xb6   : > { %vm711_vm7 = vmand %vm530_vm4, %vm710_vm2 }
  0xb7   : > { %vm732_vm5 = vmand %vm553_vm9, %vm710_vm2 }
  0xb8   : > { %vm753_vm4 = vmand %vm575_vm8, %vm710_vm2 }
  0xb9   : > { %723 = vadd.xlane.f32.xlu1 %v722_v47  ;;  %vm774_vm9 = vmand %vm597_vm13, %vm710_vm2 }
  0xbd   : > { %765 = vadd.xlane.f32.xlu1 %v764_v7 }
 0x107   : > { %v522_v44 = vpop.xlane.xlu0 %521 }
 0x108   : > { %v523_v15 = vrot.slane %v522_v44, 4 }
 0x10a   : > { %v524_v16 = vadd.f32 %v523_v15, %v522_v44 }
 0x10b   : > { %v545_v17 = vpop.xlane.xlu0 %544 }
 0x10c   : > { %v525_v18 = vrot.slane %v524_v16, 2  ;;  %v546_v30 = vrot.slane %v545_v17, 4 }
 0x10e   : > { %v547_v12 = vadd.f32 %v546_v30, %v545_v17  ;;  %v526_v19 = vadd.f32 %v525_v18, %v524_v16 }
 0x110   : > { %v548_v8 = vrot.slane %v547_v12, 2  ;;  %v527_v22 = vrot.slane %v526_v19, 1 }
 0x112   : > { %v528_v51 = vadd.f32 %v527_v22, %v526_v19  ;;  %v549_v13 = vadd.f32 %v548_v8, %v547_v12 }
 0x114   : > { %932 = vpush %v528_v51  ;;  %v550_v31 = vrot.slane %v549_v13, 1 }
 0x115   : > { %v614_v24 = vpop.xlane.xlu0 %613 }
 0x116   : > { %v551_v23 = vadd.f32 %v550_v31, %v549_v13  ;;  %v615_v25 = vrot.slane %v614_v24, 4 }
 0x118   : > { %934 = vpush %v551_v23  ;;  %v616_v38 = vadd.f32 %v615_v25, %v614_v24 }
 0x11a   : > { %v617_v32 = vrot.slane %v616_v38, 2 }
 0x11c   : > { %v618_v49 = vadd.f32 %v617_v32, %v616_v38 }
 0x11e   : > { %v619_v40 = vrot.slane %v618_v49, 1 }
 0x120   : > { %v620_v48 = vadd.f32 %v619_v40, %v618_v49 }
 0x136   : > { %v567_v26 = vpop.xlane.xlu1 %566 }
 0x137   : > { %v568_v27 = vrot.slane %v567_v26, 4 }
 0x138   : > { %v657_v28 = vpop.xlane.xlu0 %656 }
 0x139   : > { %v569_v29 = vadd.f32 %v568_v27, %v567_v26  ;;  %v658_v43 = vrot.slane %v657_v28, 4 }
 0x13a   : > { %v589_v21 = vpop.xlane.xlu1 %588 }
 0x13b   : > { %v570_v33 = vrot.slane %v569_v29, 2  ;;  %v590_v34 = vrot.slane %v589_v21, 4  ;;  %v659_v35 = vadd.f32 %v658_v43, %v657_v28 }
 0x13c   : > { %v702_v45 = vpop.xlane.xlu0 %701 }
 0x13d   : > { %v591_v36 = vadd.f32 %v590_v34, %v589_v21  ;;  %v703_v56 = vrot.slane %v702_v45, 4  ;;  %v571_v41 = vadd.f32 %v570_v33, %v569_v29  ;;  %v660_v42 = vrot.slane %v659_v35, 2 }
 0x13e   : > { %v636_v46 = vpop.xlane.xlu1 %635 }
 0x13f   : > { %v592_v20 = vrot.slane %v591_v36, 2  ;;  %v637_v50 = vrot.slane %v636_v46, 4  ;;  %v704_v54 = vadd.f32 %v703_v56, %v702_v45  ;;  %v572_v55 = vrot.slane %v571_v41, 1 }
 0x140   : > { %v745_v57 = vpop.xlane.xlu0 %744  ;;  %v661_v3 = vadd.f32 %v660_v42, %v659_v35 }
 0x141   : > { %v638_v52 = vadd.f32 %v637_v50, %v636_v46  ;;  %v746_v59 = vrot.slane %v745_v57, 4  ;;  %v573_v60 = vadd.f32 %v572_v55, %v571_v41  ;;  %v705_v61 = vrot.slane %v704_v54, 2 }
 0x142   : > { %v678_v62 = vpop.xlane.xlu1 %677  ;;  %v593_v0 = vadd.f32 %v592_v20, %v591_v36  ;;  %v662_v14 = vrot.slane %v661_v3, 1 }
 0x143   : > { %v639_v4 = vrot.slane %v638_v52, 2  ;;  %v679_v39 = vrot.slane %v678_v62, 4  ;;  %v747_v6 = vadd.f32 %v746_v59, %v745_v57  ;;  %936 = vpush %v573_v60  ;;  %v706_v58 = vadd.f32 %v705_v61, %v704_v54 }
 0x144   : > { %v594_v53 = vrot.slane %v593_v0, 1  ;;  %v663_v30 = vadd.f32 %v662_v14, %v661_v3 }
 0x145   : > { %v680_v9 = vadd.f32 %v679_v39, %v678_v62  ;;  %v640_v37 = vadd.f32 %v639_v4, %v638_v52  ;;  %v748_v63 = vrot.slane %v747_v6, 2  ;;  %v707_v12 = vrot.slane %v706_v58, 1  ;;  %s933_s21 = spop %932 }
 0x146   : > { %v724_v10 = vpop.xlane.xlu1 %723  ;;  %v595_v11 = vadd.f32 %v594_v53, %v593_v0  ;;  %v533_v32 = vstv %s933_s21 }
 0x147   : > { %v681_v47 = vrot.slane %v680_v9, 2  ;;  %v725_v5 = vrot.slane %v724_v10, 4  ;;  %v641_v7 = vrot.slane %v640_v37, 1  ;;  %v749_v17 = vadd.f32 %v748_v63, %v747_v6 }
 0x148   : > { %938 = vpush %v595_v11  ;;  %v708_v23 = vadd.f32 %v707_v12, %v706_v58  ;;  %v534_v33 = vsel %vm532_vm10, %v533_v32, 0.0 }
 0x149   : > { %v726_v44 = vadd.f32 %v725_v5, %v724_v10  ;;  %940 = vpush %v620_v48  ;;  %v642_v15 = vadd.f32 %v641_v7, %v640_v37  ;;  %v682_v16 = vadd.f32 %v681_v47, %v680_v9  ;;  %v750_v24 = vrot.slane %v749_v17, 1  ;;  %s935_s19 = spop %934 }
 0x14a   : > { %v766_v18 = vpop.xlane.xlu1 %765  ;;  %v555_v21 = vstv %s935_s19  ;;  %s1727_s19 = scalar_lea.hbm %s1778_s2, %s918_s27 }
 0x14b   : > { %v727_v19 = vrot.slane %v726_v44, 2  ;;  %v767_v8 = vrot.slane %v766_v18, 4  ;;  %942 = vpush %v642_v15  ;;  %v683_v22 = vrot.slane %v682_v16, 1  ;;  %v751_v28 = vadd.f32 %v750_v24, %v749_v17 }
 0x14c   : > { %944 = vpush %v663_v30  ;;  %v556_v34 = vsel %vm554_vm11, %v555_v21, 0.0 }
 0x14d   : > { %v768_v51 = vadd.f32 %v767_v8, %v766_v18  ;;  %v684_v13 = vadd.f32 %v683_v22, %v682_v16  ;;  %v728_v31 = vadd.f32 %v727_v19, %v726_v44  ;;  %v557_v36 = vadd.f32 %v556_v34, %v534_v33 }
 0x14f   : > { %v769_v25 = vrot.slane %v768_v51, 2  ;;  %946 = vpush %v684_v13  ;;  %v729_v26 = vrot.slane %v728_v31, 1 }
 0x150   : > { %948 = vpush %v708_v23 }
 0x151   : > { %v770_v38 = vadd.f32 %v769_v25, %v768_v51  ;;  %v730_v27 = vadd.f32 %v729_v26, %v728_v31 }
 0x153   : > { %950 = vpush %v730_v27  ;;  %v771_v29 = vrot.slane %v770_v38, 1 }
 0x154   : > { %952 = vpush %v751_v28 }
 0x155   : > { %v772_v43 = vadd.f32 %v771_v29, %v770_v38 }
 0x157   : > { %954 = vpush %v772_v43 }
 0x174   : > { %s937_s3 = spop %936 }
 0x175   : > { %v577_v35 = vstv %s937_s3  ;;  %s780_s3 = scalar_lea.sflag [#allocation4], %s1367_s8 }
 0x176   : > { %v578_v45 = vsel %vm576_vm12, %v577_v35, 0.0 }
 0x177   : > { %v579_v56 = vadd.f32 %v578_v45, %v557_v36 }
 0x179   : > { %s939_s6 = spop %938 }
 0x17a   : > { %v599_v41 = vstv %s939_s6  ;;  %s941_s20 = spop %940  ;;  %s1108_s6 = scalar_lea.vmem %s1729_s15, 64 }
 0x17b   : > { %v600_v42 = vsel %vm598_vm15, %v599_v41, 0.0  ;;  %v624_v46 = vstv %s941_s20  ;;  %p1109_p8 = scmp.ne.s32.totalorder %s1729_s15, %s1108_s6  ;;  %s1112_s20 = sshll.u32 %s1199_s12, 4  ;;  %s1113_s20 = int_to_ptr.vmem [resolvable:$false] %s1112_s20 }
 0x17c   : > { %v601_v49 = vadd.f32 %v600_v42, %v579_v56  ;;  %s943_s29 = spop %942  ;;  %v625_v20 = vsel %vm623_vm0, %v624_v46, 0.0  ;;  %p1115_p7 = scmp.lt.s32.totalorder %s1729_s15, %s1113_s20 }
 0x17d   : > { %v645_v50 = vstv %s943_s29  ;;  %s945_s30 = spop %944  ;;  %p1110_p11 = pnand %p1109_p8, %p1798_p0 }
 0x17e   : > { %v626_v54 = vadd.f32 %v625_v20, %v601_v49  ;;  %v646_v55 = vsel %vm644_vm3, %v645_v50, 0.0  ;;  %v666_v57 = vstv %s945_s30  ;;  %s1114_s29 = scalar_lea.vmem %s1113_s20, 128 }
 0x17f   : > { %v667_v59 = vsel %vm665_vm6, %v666_v57, 0.0  ;;  %p1111_p6 = pneg %p1110_p11  ;;  %p1116_p10 = scmp.lt.s32.totalorder %s1114_s29, %s1108_s6 }
 0x180   : > { %v647_v52 = vadd.f32 %v646_v55, %v626_v54  ;;  %s947_s25 = spop %946 }
 0x181   : > { %v687_v60 = vstv %s947_s25  ;;  %s949_s26 = spop %948  ;;  %p1117_p12 = por %p1116_p10, %p1115_p7 }
 0x182   : > { %v668_v61 = vadd.f32 %v667_v59, %v647_v52  ;;  %v688_v62 = vsel %vm686_vm1, %v687_v60, 0.0  ;;  %v712_v0 = vstv %s949_s26 }
 0x183   : > { %v713_v4 = vsel %vm711_vm7, %v712_v0, 0.0  ;;  %p1118_p9 = pnand %p1117_p12, %p1111_p6 }
 0x184   : > { %v689_v3 = vadd.f32 %v688_v62, %v668_v61  ;;  %s951_s7 = spop %950 }
 0x185   : > { %v733_v39 = vstv %s951_s7  ;;  %s953_s18 = spop %952 }
 0x186   : > { %v714_v6 = vadd.f32 %v713_v4, %v689_v3  ;;  %v734_v40 = vsel %vm732_vm5, %v733_v39, 0.0  ;;  %v754_v53 = vstv %s953_s18 }
 0x187   : > { %v755_v37 = vsel %vm753_vm4, %v754_v53, 0.0 }
 0x188   : > { %v735_v9 = vadd.f32 %v734_v40, %v714_v6  ;;  %s955_s5 = spop %954 }
 0x189   : > { %v775_v63 = vstv %s955_s5 }
 0x18a   : > { %v756_v10 = vadd.f32 %v755_v37, %v735_v9  ;;  %v776_v11 = vsel %vm774_vm9, %v775_v63, 0.0 }
 0x18c   : > { %v777_v14 = vadd.f32 %v776_v11, %v756_v10 }
 0x18e   : > { %778 = vst [vmem:[%s219_s28] sm:$0xf] %v777_v14 }
 0x18f   : > { %1121 = shalt.err (!%p1118_p9)
}
 0x190   : > { %s1122_s8 = scalar_lea.hbm %s1727_s19, 64  ;;  %s1126_s26 = scalar_lea.hbm %s1778_s2, 128 }
 0x191   : > { %p1123_p1 = scmp.ne.s32.totalorder %s1727_s19, %s1122_s8  ;;  %p1127_p4 = scmp.lt.u32.totalorder %s1727_s19, %s1778_s2 }
 0x192   : > { %p1128_p13 = scmp.lt.u32.totalorder %s1126_s26, %s1122_s8  ;;  %p1130_p8 = scmp.lt.u32.totalorder %s1122_s8, %s1727_s19 }
 0x193   : > { %p1124_p5 = pnand %p1123_p1, %p1798_p0 }
 0x194   : > { %p1129_p3 = por %p1128_p13, %p1127_p4 }
 0x195   : > { %p1125_p2 = pneg %p1124_p5 }
 0x196   : > { %p1131_p11 = por %p1130_p8, %p1129_p3 }
 0x198   : > { %p1132_p6 = pnand %p1131_p11, %p1125_p2 }
 0x19a   : > { %1135 = shalt.err (!%p1132_p6)
}
 0x19b   : > { %960 = dma.vmem_to_hbm [thread:$0]  (%p1798_p0), %s1729_s15, 64, %s1727_s19, %s780_s3  }
 0x19c PF: > { %s806_s18 = sand.u32 1, %s1174_s9   ;;  %p1799_p7 = scmp.ne.s32.totalorder %s1784_s24, 0 }
 0x19d   : > { %p1800_p10 = scmp.ge.s32.totalorder %s1194_s14, 2  ;;  %s807_s5 = scalar_lea.sflag [#allocation4], %s806_s18 }
 0x19f   : > { %p970_p12 = pnand %p1800_p10, %p1799_p7 }
 0x1a1   : > { %1169 = dma.done.wait (!%p970_p12), %s807_s5, 64  }
 0x1a2   : > { %1171 = vsyncadd (!%p970_p12), %s807_s5, 4294967232  ;;  %s21_s14 = sadd.s32 1, %s1194_s14   ;;  %s1801_s9 = smov %s1178_s10 }
 0x1a3   : > { %p18_p9 = scmp.ge.s32.totalorder %s21_s14, 4   ;;  %s1802_s10 = smov %s1182_s11 }
 0x1a4   : > { %s1803_s11 = smov %s1271_s23  ;;  %s1804_s12 = smov %s1190_s13 }
 0x1a5   : > { %s1805_s13 = smov %s1807_s17  ;;  %20 = sbr.rel (!%p18_p9) target bundleno = 8 (0x8), region = 88 }
 0x1ac   :  { %812 = vsyncpa [#allocation3], 1 }
 0x1ad   :  { %814 = vsyncpa [#allocation3 + $0x1], 1 }
 0x1ae   :  { %815 = vsyncpa [#allocation6], 1 }
 0x1af   :  { %817 = vsyncpa [#allocation6 + $0x1], 1 }
 0x1b0   :  { %818 = vsyncpa [#allocation4], 1 }
 0x1b1   :  { %820 = vsyncpa [#allocation4 + $0x1], 1 }

</bundles_post_ra>
